<compile_context>
chip_gen: v7x
topology: tpu7x:2x2x1
jax: 0.10.0
libtpu: 0.0.40
codegen_flags: <defaults>
</compile_context>

<pallas_src>
import jax
import jax.numpy as jnp
from jax.experimental import pallas as pl
from jax.experimental.pallas import tpu as pltpu


def _round_up(x, m):
    return (x + m - 1) // m * m


_NT = (((1,), (1,)), ((), ()))   # contract the last axis of both operands


def _policy_kernel(x_ref, w1_ref, b1_ref, w2_ref, b2_ref,
                   wh_ref, bh_ref, scale_ref, center_ref, out_ref):
    """Fused MLP.  x_ref is (TILE_B, ob_dim); everything downstream is
    feature-major (features, TILE_B) so the lane axis carries the batch."""
    f32 = jnp.float32
    cdt = w1_ref.dtype                        # MXU operand dtype (bf16 or f32)

    # layer 1: relu(W1 @ x^T + b1) -> (H1, TILE_B); NT matmul, x stays batch-major.
    h = jax.lax.dot_general(w1_ref[...], x_ref[...], _NT,
                            preferred_element_type=f32) + b1_ref[...]
    h = jnp.maximum(h, 0.0).astype(cdt)

    # layer 2: relu(W2 @ h + b2) -> (H2, TILE_B)
    h = jnp.dot(w2_ref[...], h, preferred_element_type=f32) + b2_ref[...]
    h = jnp.maximum(h, 0.0).astype(cdt)

    # merged head: one matmul, one full-sublane unmasked (2*AC, TILE_B) store.
    #   rows [0, ac)    -> mu  = tanh(o) * scale + center
    #   rows [ac, 2*ac) -> std = exp(o)   (log_std*scale folded into W/b rows)
    o = jnp.dot(wh_ref[...], h, preferred_element_type=f32) + bh_ref[...]
    ac = out_ref.shape[0] // 2
    row = jax.lax.broadcasted_iota(jnp.int32, o.shape, 0)
    mu = jnp.tanh(o) * scale_ref[...] + center_ref[...]
    std = jnp.exp(o)
    out_ref[...] = jnp.where(row < ac, mu, std).astype(out_ref.dtype)


def _batch_tiling(batch, tile_b_max):
    """Pick (tile, num_blocks, padded_batch) for the 1-D batch grid."""
    lane = 128
    tile_b_max = max(lane, _round_up(tile_b_max, lane))
    b_lanes = _round_up(max(batch, 1), lane)
    if b_lanes >= 2 * lane:
        # Keep >= 2 grid steps (v7x megacore occupancy) while still handing
        # each step the largest lane-aligned tile tile_b_max allows.
        tile = min(tile_b_max, _round_up(b_lanes // 2, lane))
    else:
        tile = b_lanes
    nb = -(-batch // tile)
    return tile, nb, nb * tile


def squashed_gaussian_policy(x, w1, b1, w2, b2, wo, bo, max_ac, min_ac,
                             *, tile_b=4096, compute_dtype=jnp.bfloat16):
    """Fused forward pass.

    Weights use the PyTorch nn.Linear layout: w* is (out, in), b* is (out,).
    `wo`/`bo` are the output layer stacked as [mu | log_std] along its output
    dim.  Returns (mu, std) in f32, each (B, ac_dim) — the parameters of
    Independent(Normal(mu, std), 1); eval mode of the module is just `mu`.
    `tile_b` is the batch tile (sweep 2048-8192; larger is better until the
    v5e vst slot saturates).  MXU operands are cast to `compute_dtype`
    (bf16 by default on every generation); accumulation and the
    bias/relu/tanh/exp epilogue stay f32.
    """
    B, ob_dim = x.shape
    h1, h2 = w1.shape[0], w2.shape[0]
    ac_dim = max_ac.shape[-1]
    assert wo.shape == (2 * ac_dim, h2) and bo.shape == (2 * ac_dim,)

    f32 = jnp.float32
    scale = ((max_ac - min_ac) * 0.5).astype(f32).reshape(ac_dim, 1)
    center = ((max_ac + min_ac) * 0.5).astype(f32).reshape(ac_dim, 1)

    # Merged head: rows [0,ac) = mu head, rows [ac,2ac) = log_std head with
    # the `out[:, ac:] * scale` fold applied to weights/bias in f32.
    w_head = jnp.concatenate([wo[:ac_dim], wo[ac_dim:] * scale], axis=0)
    b_head = jnp.concatenate([bo[:ac_dim], bo[ac_dim:] * scale[:, 0]],
                             axis=0).astype(f32).reshape(2 * ac_dim, 1)
    zeros = jnp.zeros((ac_dim, 1), f32)          # std rows are masked anyway
    scale_f = jnp.concatenate([scale, zeros], axis=0)
    center_f = jnp.concatenate([center, zeros], axis=0)

    cdt = compute_dtype
    w1c, w2c, whc = w1.astype(cdt), w2.astype(cdt), w_head.astype(cdt)
    b1c = b1.astype(f32).reshape(h1, 1)
    b2c = b2.astype(f32).reshape(h2, 1)

    tile, nb, b_pad = _batch_tiling(B, tile_b)
    xc = x.astype(cdt)                           # batch-major, NO transpose
    if b_pad != B:
        # TODO(synk): rely on Pallas's implicit partial-block padding to drop
        # this copy for non-tile-aligned batches; tile-aligned batches skip it.
        xc = jnp.pad(xc, ((0, b_pad - B), (0, 0)))

    def resident(arr):                           # params stay VMEM-resident
        return pl.BlockSpec(arr.shape, lambda i: (0, 0))

    itemsz = jnp.dtype(cdt).itemsize
    flops = 2 * b_pad * (ob_dim * h1 + h1 * h2 + h2 * 2 * ac_dim)
    bytes_accessed = (b_pad * ob_dim * itemsz
                      + 2 * ac_dim * b_pad * 4
                      + (w1c.size + w2c.size + whc.size) * itemsz
                      + (b1c.size + b2c.size + b_head.size
                         + scale_f.size + center_f.size) * 4)

    out = pl.pallas_call(
        _policy_kernel,
        out_shape=jax.ShapeDtypeStruct((2 * ac_dim, b_pad), f32),
        grid=(nb,),
        in_specs=[
            pl.BlockSpec((tile, ob_dim), lambda i: (i, 0)),   # x batch tile
            resident(w1c), resident(b1c),
            resident(w2c), resident(b2c),
            resident(whc), resident(b_head),
            resident(scale_f), resident(center_f),
        ],
        out_specs=pl.BlockSpec((2 * ac_dim, tile), lambda i: (0, i)),
        compiler_params=pltpu.CompilerParams(
            dimension_semantics=("parallel",)),
        cost_estimate=pl.CostEstimate(
            flops=flops,
            transcendentals=2 * b_pad * 2 * ac_dim,
            bytes_accessed=bytes_accessed),
    )(xc, w1c, b1c, w2c, b2c, whc, b_head, scale_f, center_f)

    # Slice BEFORE transposing so padded columns never hit the transpose.
    mu = out[:ac_dim, :B].T
    std = out[ac_dim:, :B].T
    # TODO(synk): Independent(Normal(mu, std), 1) sampling / log_prob and the
    # training/eval switch stay in host JAX; eval mode just uses `mu`.
    return mu, std


def _reference(x, w1, b1, w2, b2, wo, bo, max_ac, min_ac):
    """Pure-JAX f32 reference mirroring the PyTorch module (HIGHEST precision)."""
    pH = jax.lax.Precision.HIGHEST
    scale = (max_ac - min_ac) / 2.0
    center = (max_ac + min_ac) / 2.0
    h = jnp.maximum(jnp.dot(x, w1.T, precision=pH) + b1, 0.0)
    h = jnp.maximum(jnp.dot(h, w2.T, precision=pH) + b2, 0.0)
    o = jnp.dot(h, wo.T, precision=pH) + bo
    ac_dim = o.shape[-1] // 2
    mu = jnp.tanh(o[:, :ac_dim]) * scale + center
    std = jnp.exp(o[:, ac_dim:] * scale)
    return mu, std


if __name__ == "__main__":
    # Module hyperparameters (small shapes): ob_dim=16, ac_dim=4, hidden=[32,32]
    B, ob_dim, ac_dim = 32, 16, 4
    hidden = [32, 32]

    key = jax.random.PRNGKey(0)
    keys = jax.random.split(key, 8)
    x = jax.random.normal(keys[0], (B, ob_dim), jnp.float32)

    # PyTorch nn.Linear layout: weight (out, in), bias (out,)
    w1 = jax.random.normal(keys[1], (hidden[0], ob_dim), jnp.float32) * 0.1
    b1 = jax.random.normal(keys[2], (hidden[0],), jnp.float32) * 0.1
    w2 = jax.random.normal(keys[3], (hidden[1], hidden[0]), jnp.float32) * 0.1
    b2 = jax.random.normal(keys[4], (hidden[1],), jnp.float32) * 0.1
    wo = jax.random.normal(keys[5], (2 * ac_dim, hidden[1]), jnp.float32) * 0.1
    bo = jax.random.normal(keys[6], (2 * ac_dim,), jnp.float32) * 0.1

    max_ac = jnp.array([1.0, 2.0, 0.5, 1.5], jnp.float32)
    min_ac = jnp.array([-1.0, -2.0, -0.5, -0.5], jnp.float32)

    mu_ref, std_ref = _reference(x, w1, b1, w2, b2, wo, bo, max_ac, min_ac)

    # Default path: bf16 MXU operands on all generations, f32 epilogue.
    mu, std = squashed_gaussian_policy(x, w1, b1, w2, b2, wo, bo, max_ac, min_ac)
    jax.block_until_ready((mu, std))
    assert mu.shape == (B, ac_dim) and std.shape == (B, ac_dim)
    assert jnp.allclose(mu, mu_ref, atol=1e-1, rtol=1e-1), "mu mismatch (bf16)"
    assert jnp.allclose(std, std_ref, atol=1e-1, rtol=1e-1), "std mismatch (bf16)"

    # f32 MXU operands: tighter check of the fused math (merged head + fold).
    mu32, std32 = squashed_gaussian_policy(x, w1, b1, w2, b2, wo, bo,
                                           max_ac, min_ac,
                                           compute_dtype=jnp.float32)
    jax.block_until_ready((mu32, std32))
    assert jnp.allclose(mu32, mu_ref, atol=1e-2, rtol=1e-2), "mu mismatch (f32)"
    assert jnp.allclose(std32, std_ref, atol=1e-2, rtol=1e-2), "std mismatch (f32)"

    # Multi-tile grid path (>= 2 "parallel" steps, batch not tile-aligned).
    B2 = 260
    x2 = jax.random.normal(keys[7], (B2, ob_dim), jnp.float32)
    mu2_ref, std2_ref = _reference(x2, w1, b1, w2, b2, wo, bo, max_ac, min_ac)
    mu2, std2 = squashed_gaussian_policy(x2, w1, b1, w2, b2, wo, bo,
                                         max_ac, min_ac)
    jax.block_until_ready((mu2, std2))
    assert mu2.shape == (B2, ac_dim) and std2.shape == (B2, ac_dim)
    assert jnp.allclose(mu2, mu2_ref, atol=1e-1, rtol=1e-1), "mu mismatch (multi-tile)"
    assert jnp.allclose(std2, std2_ref, atol=1e-1, rtol=1e-1), "std mismatch (multi-tile)"

    print("KERNEL_OK")
</pallas_src>

<mosaic_0001>
module attributes {stable_mosaic.version = 11 : i64} {
  func.func @_policy_kernel(%arg0: i32, %arg1: memref<128x16xbf16, #tpu.memory_space<vmem>>, %arg2: memref<32x16xbf16, #tpu.memory_space<vmem>>, %arg3: memref<32x1xf32, #tpu.memory_space<vmem>>, %arg4: memref<32x32xbf16, #tpu.memory_space<vmem>>, %arg5: memref<32x1xf32, #tpu.memory_space<vmem>>, %arg6: memref<8x32xbf16, #tpu.memory_space<vmem>>, %arg7: memref<8x1xf32, #tpu.memory_space<vmem>>, %arg8: memref<8x1xf32, #tpu.memory_space<vmem>>, %arg9: memref<8x1xf32, #tpu.memory_space<vmem>>, %arg10: memref<8x128xf32, #tpu.memory_space<vmem>>) attributes {dimension_semantics = [#tpu.dimension_semantics<parallel>], iteration_bounds = array<i64: 1>, scalar_prefetch = 0 : i64, scratch_operands = 0 : i64, tpu.core_type = #tpu.core_type<tc>, window_params = [{transform_indices = @transform_0, window_bounds = array<i64: 128, 16>}, {pipeline_mode = #tpu.pipeline_mode<synchronous>, transform_indices = @transform_1, window_bounds = array<i64: 32, 16>}, {pipeline_mode = #tpu.pipeline_mode<synchronous>, transform_indices = @transform_2, window_bounds = array<i64: 32, 1>}, {pipeline_mode = #tpu.pipeline_mode<synchronous>, transform_indices = @transform_3, window_bounds = array<i64: 32, 32>}, {pipeline_mode = #tpu.pipeline_mode<synchronous>, transform_indices = @transform_4, window_bounds = array<i64: 32, 1>}, {pipeline_mode = #tpu.pipeline_mode<synchronous>, transform_indices = @transform_5, window_bounds = array<i64: 8, 32>}, {pipeline_mode = #tpu.pipeline_mode<synchronous>, transform_indices = @transform_6, window_bounds = array<i64: 8, 1>}, {pipeline_mode = #tpu.pipeline_mode<synchronous>, transform_indices = @transform_7, window_bounds = array<i64: 8, 1>}, {pipeline_mode = #tpu.pipeline_mode<synchronous>, transform_indices = @transform_8, window_bounds = array<i64: 8, 1>}, {transform_indices = @transform_9, window_bounds = array<i64: 8, 128>}]} {
    %c0 = arith.constant 0 : index
    %c0_0 = arith.constant 0 : index
    %0 = vector.load %arg2[%c0, %c0_0] : memref<32x16xbf16, #tpu.memory_space<vmem>>, vector<32x16xbf16>
    %c0_1 = arith.constant 0 : index
    %c0_2 = arith.constant 0 : index
    %1 = vector.load %arg1[%c0_1, %c0_2] : memref<128x16xbf16, #tpu.memory_space<vmem>>, vector<128x16xbf16>
    %cst = arith.constant dense<0.000000e+00> : vector<32x128xf32>
    %2 = tpu.matmul %0, %1, %cst {dimension_numbers = #tpu.dot_dimension_numbers<[1], [1], [0], [0], [0, 0, 1, 0], [], []>} : vector<32x16xbf16>, vector<128x16xbf16>, vector<32x128xf32> -> vector<32x128xf32>
    %c0_3 = arith.constant 0 : index
    %c0_4 = arith.constant 0 : index
    %3 = vector.load %arg3[%c0_3, %c0_4] : memref<32x1xf32, #tpu.memory_space<vmem>>, vector<32x1xf32>
    %4 = vector.broadcast %3 : vector<32x1xf32> to vector<32x128xf32>
    %5 = arith.addf %2, %4 : vector<32x128xf32>
    %cst_5 = arith.constant 0.000000e+00 : f32
    %6 = vector.broadcast %cst_5 : f32 to vector<32x128xf32>
    %7 = arith.maximumf %5, %6 : vector<32x128xf32>
    %8 = arith.truncf %7 : vector<32x128xf32> to vector<32x128xbf16>
    %c0_6 = arith.constant 0 : index
    %c0_7 = arith.constant 0 : index
    %9 = vector.load %arg4[%c0_6, %c0_7] : memref<32x32xbf16, #tpu.memory_space<vmem>>, vector<32x32xbf16>
    %cst_8 = arith.constant dense<0.000000e+00> : vector<32x128xf32>
    %10 = tpu.matmul %9, %8, %cst_8 {dimension_numbers = #tpu.dot_dimension_numbers<[1], [0], [0], [1], [0, 0, 1, 1], [], []>} : vector<32x32xbf16>, vector<32x128xbf16>, vector<32x128xf32> -> vector<32x128xf32>
    %c0_9 = arith.constant 0 : index
    %c0_10 = arith.constant 0 : index
    %11 = vector.load %arg5[%c0_9, %c0_10] : memref<32x1xf32, #tpu.memory_space<vmem>>, vector<32x1xf32>
    %12 = vector.broadcast %11 : vector<32x1xf32> to vector<32x128xf32>
    %13 = arith.addf %10, %12 : vector<32x128xf32>
    %cst_11 = arith.constant 0.000000e+00 : f32
    %14 = vector.broadcast %cst_11 : f32 to vector<32x128xf32>
    %15 = arith.maximumf %13, %14 : vector<32x128xf32>
    %16 = arith.truncf %15 : vector<32x128xf32> to vector<32x128xbf16>
    %c0_12 = arith.constant 0 : index
    %c0_13 = arith.constant 0 : index
    %17 = vector.load %arg6[%c0_12, %c0_13] : memref<8x32xbf16, #tpu.memory_space<vmem>>, vector<8x32xbf16>
    %cst_14 = arith.constant dense<0.000000e+00> : vector<8x128xf32>
    %18 = tpu.matmul %17, %16, %cst_14 {dimension_numbers = #tpu.dot_dimension_numbers<[1], [0], [0], [1], [0, 0, 1, 1], [], []>} : vector<8x32xbf16>, vector<32x128xbf16>, vector<8x128xf32> -> vector<8x128xf32>
    %c0_15 = arith.constant 0 : index
    %c0_16 = arith.constant 0 : index
    %19 = vector.load %arg7[%c0_15, %c0_16] : memref<8x1xf32, #tpu.memory_space<vmem>>, vector<8x1xf32>
    %20 = vector.broadcast %19 : vector<8x1xf32> to vector<8x128xf32>
    %21 = arith.addf %18, %20 : vector<8x128xf32>
    %22 = tpu.iota {dimensions = array<i32: 0>} : vector<8x128xi32>
    %23 = math.tanh %21 : vector<8x128xf32>
    %c0_17 = arith.constant 0 : index
    %c0_18 = arith.constant 0 : index
    %24 = vector.load %arg8[%c0_17, %c0_18] : memref<8x1xf32, #tpu.memory_space<vmem>>, vector<8x1xf32>
    %25 = vector.broadcast %24 : vector<8x1xf32> to vector<8x128xf32>
    %26 = arith.mulf %23, %25 : vector<8x128xf32>
    %c0_19 = arith.constant 0 : index
    %c0_20 = arith.constant 0 : index
    %27 = vector.load %arg9[%c0_19, %c0_20] : memref<8x1xf32, #tpu.memory_space<vmem>>, vector<8x1xf32>
    %28 = vector.broadcast %27 : vector<8x1xf32> to vector<8x128xf32>
    %29 = arith.addf %26, %28 : vector<8x128xf32>
    %30 = math.exp %21 : vector<8x128xf32>
    %c4_i32 = arith.constant 4 : i32
    %31 = vector.broadcast %c4_i32 : i32 to vector<8x128xi32>
    %32 = arith.cmpi slt, %22, %31 : vector<8x128xi32>
    %33 = arith.select %32, %29, %30 : vector<8x128xi1>, vector<8x128xf32>
    %c0_21 = arith.constant 0 : index
    %c0_22 = arith.constant 0 : index
    %34 = vector.load %arg10[%c0_21, %c0_22] : memref<8x128xf32, #tpu.memory_space<vmem>>, vector<8x128xf32>
    tpu.vector_store %arg10[%c0_21, %c0_22], %33 {strides = array<i32>} : memref<8x128xf32, #tpu.memory_space<vmem>>, vector<8x128xf32>,
    return
  }
  func.func @transform_0(%arg0: i32) -> (i32, i32) {
    %c0_i32 = arith.constant 0 : i32
    %c0_i32_0 = arith.constant 0 : i32
    return %arg0, %c0_i32 : i32, i32
  }
  func.func @transform_1(%arg0: i32) -> (i32, i32) {
    %c0_i32 = arith.constant 0 : i32
    %c0_i32_0 = arith.constant 0 : i32
    %c0_i32_1 = arith.constant 0 : i32
    return %c0_i32, %c0_i32_0 : i32, i32
  }
  func.func @transform_2(%arg0: i32) -> (i32, i32) {
    %c0_i32 = arith.constant 0 : i32
    %c0_i32_0 = arith.constant 0 : i32
    %c0_i32_1 = arith.constant 0 : i32
    return %c0_i32, %c0_i32_0 : i32, i32
  }
  func.func @transform_3(%arg0: i32) -> (i32, i32) {
    %c0_i32 = arith.constant 0 : i32
    %c0_i32_0 = arith.constant 0 : i32
    %c0_i32_1 = arith.constant 0 : i32
    return %c0_i32, %c0_i32_0 : i32, i32
  }
  func.func @transform_4(%arg0: i32) -> (i32, i32) {
    %c0_i32 = arith.constant 0 : i32
    %c0_i32_0 = arith.constant 0 : i32
    %c0_i32_1 = arith.constant 0 : i32
    return %c0_i32, %c0_i32_0 : i32, i32
  }
  func.func @transform_5(%arg0: i32) -> (i32, i32) {
    %c0_i32 = arith.constant 0 : i32
    %c0_i32_0 = arith.constant 0 : i32
    %c0_i32_1 = arith.constant 0 : i32
    return %c0_i32, %c0_i32_0 : i32, i32
  }
  func.func @transform_6(%arg0: i32) -> (i32, i32) {
    %c0_i32 = arith.constant 0 : i32
    %c0_i32_0 = arith.constant 0 : i32
    %c0_i32_1 = arith.constant 0 : i32
    return %c0_i32, %c0_i32_0 : i32, i32
  }
  func.func @transform_7(%arg0: i32) -> (i32, i32) {
    %c0_i32 = arith.constant 0 : i32
    %c0_i32_0 = arith.constant 0 : i32
    %c0_i32_1 = arith.constant 0 : i32
    return %c0_i32, %c0_i32_0 : i32, i32
  }
  func.func @transform_8(%arg0: i32) -> (i32, i32) {
    %c0_i32 = arith.constant 0 : i32
    %c0_i32_0 = arith.constant 0 : i32
    %c0_i32_1 = arith.constant 0 : i32
    return %c0_i32, %c0_i32_0 : i32, i32
  }
  func.func @transform_9(%arg0: i32) -> (i32, i32) {
    %c0_i32 = arith.constant 0 : i32
    %c0_i32_0 = arith.constant 0 : i32
    return %c0_i32, %arg0 : i32, i32
  }
}

</mosaic_0001>

<bundles_post_ra>
// kernel: tpu_custom_call.1
= control target key start
LH: loop header
LB: loop body
LE: loop exit
PB: predicated region body
PF: predicated region fallthrough
CT: control target
= control target key end

     0   :  { %vm128_vm0 = vcmask 130048   ;;  %v524_v3 = vmov 0   ;;  %s683_s0 = inlined_call_operand.vmem [shape: bf16[128,16], index: 0, kind: input, shape index: {}]   ;;  %s684_s1 = inlined_call_operand.vmem [shape: bf16[32,16], index: 1, kind: input, shape index: {}]   ;;  %s685_s2 = inlined_call_operand.vmem [shape: f32[32,1], index: 2, kind: input, shape index: {}]   ;;  %s686_s3 = inlined_call_operand.vmem [shape: bf16[32,32], index: 3, kind: input, shape index: {}]   ;;  %s687_s4 = inlined_call_operand.vmem [shape: f32[32,1], index: 4, kind: input, shape index: {}]   ;;  %s688_s5 = inlined_call_operand.vmem [shape: bf16[8,32], index: 5, kind: input, shape index: {}]   ;;  %s689_s6 = inlined_call_operand.vmem [shape: f32[8,1], index: 6, kind: input, shape index: {}]   ;;  %s690_s7 = inlined_call_operand.vmem [shape: f32[8,1], index: 7, kind: input, shape index: {}]   ;;  %s691_s8 = inlined_call_operand.vmem [shape: f32[8,1], index: 8, kind: input, shape index: {}]   ;;  %s692_s9 = inlined_call_operand.hbm [shape: f32[8,128], index: 9, kind: output, shape index: {}]  }
   0x1   :  { %v484_v0 = vld [vmem:[%s683_s0] sm:$0xff]   ;;  %v485_v1 = vld [vmem:[%s683_s0 + $0x8] sm:$0xff]   ;;  %482 = vset.pattern.permute.xlu0 %v524_v3  ;;  %483 = vset.pattern.permute.xlu1 %v524_v3  ;;  %v486_v4 = vld [vmem:[%s683_s0 + $0x10] sm:$0xff]  }
   0x2   :  { %470 = vmatprep.subr.msk.bf16.mxu0 %vm128_vm0, %v484_v0  ;;  %v136_v2 = vsel %vm128_vm0, %v484_v0, 0  ;;  %v139_v5 = vsel %vm128_vm0, %v485_v1, 0  ;;  %v492_v6 = vld [vmem:[%s684_s1] sm:$0xff]   ;;  %v56_v8 = vld [vmem:[%s685_s2 + $0x10] sm:$0xff]  ;;  %v55_v9 = vld [vmem:[%s685_s2 + $0x8] sm:$0xff] }
   0x3   :  { %435 = vmatpush3.bf16.xpose.msra.mxu0 %v136_v2  ;;  %450 = vmatprep.mubr.msk.bf16.mxu0 %vm128_vm0, %v492_v6  ;;  %v54_v7 = vld [vmem:[%s685_s2] sm:$0xff]  ;;  %v57_v10 = vld [vmem:[%s685_s2 + $0x18] sm:$0xff] }
   0x4   :  { %471 = vmatprep.subr.msk.bf16.mxu0 %vm128_vm0, %v485_v1  ;;  %60 = vperm.xlu0 %482, %v54_v7  }
   0x5   :  { %70 = vperm.xlu1 %483, %v56_v8  }
   0x8   :  { %65 = vperm.xlu0 %482, %v55_v9  }
   0xb   :  { %437 = vmatpush3.bf16.xpose.msra.mxu0 %v139_v5 }
   0xc   :  { %472 = vmatprep.subr.msk.bf16.mxu0 %vm128_vm0, %v486_v4 }
   0xd   :  { %14 = vsyncpa [#allocation3], 0  ;;  %v142_v11 = vsel %vm128_vm0, %v486_v4, 0  ;;  %v487_v12 = vld [vmem:[%s683_s0 + $0x18] sm:$0xff]   ;;  %v218_v13 = vld [vmem:[%s687_s4] sm:$0xff]  ;;  %75 = vperm.xlu1 %483, %v57_v10   ;;  %vm252_vm1 = vcmask 261120  }
   0xe   :  { %v219_v14 = vld [vmem:[%s687_s4 + $0x8] sm:$0xff]  ;;  %224 = vperm.xlu0 %482, %v218_v13   ;;  %v220_v15 = vld [vmem:[%s687_s4 + $0x10] sm:$0xff]  ;;  %v221_v16 = vld [vmem:[%s687_s4 + $0x18] sm:$0xff]  ;;  %v145_v17 = vsel %vm128_vm0, %v487_v12, 0  ;;  %v525_v50 = vmov 0.0   ;;  %vm526_vm2 = vmmov 0   ;;  %v364_v13 = vlaneseq }
   0xf   :  { %v488_v18 = vld [vmem:[%s683_s0 + $0x20] sm:$0xff]   ;;  %v489_v23 = vld [vmem:[%s683_s0 + $0x28] sm:$0xff]   ;;  %v490_v25 = vld [vmem:[%s683_s0 + $0x30] sm:$0xff]   ;;  %s527_s28 = smov [#allocation2]  }
  0x10   :  { %v315_v19 = vld [vmem:[%s689_s6] sm:$0xff]  ;;  %v148_v22 = vsel %vm128_vm0, %v488_v18, 0  ;;  %v151_v24 = vsel %vm128_vm0, %v489_v23, 0  ;;  %v154_v26 = vsel %vm128_vm0, %v490_v25, 0  ;;  %v491_v27 = vld [vmem:[%s683_s0 + $0x38] sm:$0xff]   ;;  %v493_v29 = vld [vmem:[%s684_s1 + $0x8] sm:$0xff]  }
  0x11   :  { %229 = vperm.xlu1 %483, %v219_v14   ;;  %v367_v20 = vld [vmem:[%s690_s7] sm:$0xff]  ;;  %v157_v28 = vsel %vm128_vm0, %v491_v27, 0  ;;  %v495_v49 = vld [vmem:[%s686_s3 + $0x8] sm:$0xff]   ;;  %v365_v14 = vshrl.u32 %v364_v13, 7  ;;  %s392_s29 = sshll.u32 %s527_s28, 4  ;;  %s393_s29 = int_to_ptr.vmem [resolvable:$true] %s392_s29 }
  0x12   :  { %234 = vperm.xlu0 %482, %v220_v15   ;;  %v374_v21 = vld [vmem:[%s691_s8] sm:$0xff]  ;;  %p505_p1 = scmp.lt.s32.totalorder %s393_s29, %s393_s29 }
  0x13   :  { %439 = vmatpush3.bf16.xpose.msra.mxu0 %v142_v11  ;;  %v494_v30 = vld [vmem:[%s686_s3] sm:$0xff]   ;;  %vm383_vm3 = vcmp.lt.s32.totalorder %v365_v14, 4 }
  0x14   :  { %473 = vmatprep.subr.msk.bf16.mxu0 %vm128_vm0, %v487_v12  ;;  %458 = vmatprep.mubr.msk.bf16.mxu1 %vm252_vm1, %v494_v30  ;;  %v314_v5 = vld [vmem:[%s688_s5] sm:$0xf]  ;;  %s500_s5 = scalar_lea.vmem %s393_s29, 128 }
  0x15   :  { %239 = vperm.xlu1 %483, %v221_v16   ;;  %p501_p0 = scmp.ne.s32.totalorder %s393_s29, %s500_s5  ;;  %p506_p2 = scmp.lt.s32.totalorder %s500_s5, %s500_s5 }
  0x16   :  { %318 = vperm.xlu0 %482, %v315_v19  }
  0x17   :  { %p507_p3 = por %p506_p2, %p505_p1 }
  0x19   :  { %370 = vperm.xlu1 %483, %v367_v20   ;;  %p508_p4 = pnand %p507_p3, %p501_p0 }
  0x1a   :  { %377 = vperm.xlu0 %482, %v374_v21  }
  0x1b   :  { %441 = vmatpush3.bf16.xpose.msra.mxu0 %v145_v17 }
  0x1c   :  { %474 = vmatprep.subr.msk.bf16.mxu0 %vm128_vm0, %v488_v18 }
  0x23   :  { %443 = vmatpush3.bf16.xpose.msra.mxu0 %v148_v22 }
  0x24   :  { %475 = vmatprep.subr.msk.bf16.mxu0 %vm128_vm0, %v489_v23 }
  0x2b   :  { %445 = vmatpush3.bf16.xpose.msra.mxu0 %v151_v24 }
  0x2c   :  { %476 = vmatprep.subr.msk.bf16.mxu0 %vm128_vm0, %v490_v25 }
  0x33   :  { %447 = vmatpush3.bf16.xpose.msra.mxu0 %v154_v26 }
  0x34   :  { %477 = vmatprep.subr.msk.bf16.mxu0 %vm128_vm0, %v491_v27 }
  0x3b   :  { %449 = vmatpush3.bf16.xpose.msra.mxu0 %v157_v28 }
  0x42   :  { %451 = vmatmul.mubr.msk.bf16.vlgmr.msra.gmra.mrb[0].mxu0 %vm128_vm0, %v493_v29 }
  0x83   :  { %v61_v32 = vpop.permute.xlu0 %60 }
  0x84   :  { %v71_v31 = vpop.permute.xlu1 %70 }
  0x87   :  { %v66_v39 = vpop.permute.xlu0 %65 }
  0x8c   :  { %v76_v36 = vpop.permute.xlu1 %75 }
  0x8d   :  { %v225_v51 = vpop.permute.xlu0 %224 }
  0x90   :  { %v230_v52 = vpop.permute.xlu1 %229 }
  0x91   :  { %v235_v53 = vpop.permute.xlu0 %234 }
  0x94   :  { %v240_v57 = vpop.permute.xlu1 %239 }
  0x95   :  { %v319_v6 = vpop.permute.xlu0 %318 }
  0x98   :  { %v371_v16 = vpop.permute.xlu1 %370 }
  0x99   :  { %v378_v18 = vpop.permute.xlu0 %377 }
 0x115   :  { %v452_v33 = vpop.f32.mrb[0].mxu0 }
 0x116   :  { %v202_v34 = vadd.f32 %v452_v33, %v71_v31  ;;  %v193_v35 = vpop.f32.mrb[1].mxu0 }
 0x117   :  { %v194_v37 = vadd.f32 %v193_v35, %v61_v32  ;;  %v453_v38 = vpop.f32.mrb[2].mxu0 }
 0x118   :  { %v205_v40 = vadd.f32 %v453_v38, %v76_v36  ;;  %v196_v41 = vpop.f32.mrb[3].mxu0  ;;  %v210_v43 = vmax.f32 %v202_v34, 0.0 }
 0x119   :  { %v197_v42 = vadd.f32 %v196_v41, %v66_v39  ;;  %v208_v45 = vmax.f32 %v194_v37, 0.0 }
 0x11a   :  { %v211_v44 = vmax.f32 %v205_v40, 0.0 }
 0x11b   :  { %v209_v46 = vmax.f32 %v197_v42, 0.0 }
 0x11c   :  { %v213_v47 = vpack.c.bf16 %v211_v44, %v210_v43 }
 0x11d   :  { %v212_v48 = vpack.c.bf16 %v209_v46, %v208_v45 }
 0x11f   :  { %454 = vmatprep.subr.bf16.mxu1 %v212_v48 }
 0x120   :  { %455 = vmatpush3.bf16.msra.mxu1 %v212_v48 }
 0x121   :  { %456 = vmatprep.subr.bf16.mxu1 %v213_v47 }
 0x124   :  { %457 = vmatpush3.bf16.msra.mxu1 %v213_v47 }
 0x125   :  { %462 = vmatprep.subr.bf16.mxu1 %v525_v50 }
 0x127   :  { %459 = vmatmul.mubr.msk.bf16.vlgmr.msra.gmra.mrb[0].mxu1 %vm252_vm1, %v495_v49 }
 0x128   :  { %466 = vmatprep.mubr.msk.bf16.mxu1 %vm526_vm2, %v525_v50 }
 0x1fa   :  { %v460_v54 = vpop.f32.mrb[0].mxu1 }
 0x1fb   :  { %v302_v55 = vadd.f32 %v460_v54, %v235_v53  ;;  %v293_v56 = vpop.f32.mrb[1].mxu1 }
 0x1fc   :  { %v294_v58 = vadd.f32 %v293_v56, %v225_v51  ;;  %v461_v59 = vpop.f32.mrb[2].mxu1 }
 0x1fd   :  { %v305_v60 = vadd.f32 %v461_v59, %v240_v57  ;;  %v296_v61 = vpop.f32.mrb[3].mxu1  ;;  %v310_v63 = vmax.f32 %v302_v55, 0.0 }
 0x1fe   :  { %v297_v62 = vadd.f32 %v296_v61, %v230_v52  ;;  %v308_v1 = vmax.f32 %v294_v58, 0.0 }
 0x1ff   :  { %v311_v0 = vmax.f32 %v305_v60, 0.0 }
 0x200   :  { %v309_v2 = vmax.f32 %v297_v62, 0.0 }
 0x201   :  { %v313_v3 = vpack.c.bf16 %v311_v0, %v310_v63 }
 0x202   :  { %v312_v4 = vpack.c.bf16 %v309_v2, %v308_v1 }
 0x204   :  { %463 = vmatpush3.bf16.msra.mxu1 %v312_v4 }
 0x205   :  { %464 = vmatprep.subr.bf16.mxu1 %v525_v50 }
 0x208   :  { %465 = vmatpush3.bf16.msra.mxu1 %v313_v3 }
 0x20b   :  { %467 = vmatmul.mubr.msk.bf16.vlgmr.msra.gmra.mrb[4].mxu1 %vm252_vm1, %v314_v5 }
 0x2de   :  { %v358_v7 = vpop.f32.mrb[4].mxu1 }
 0x2df   :  { %v359_v8 = vadd.f32 %v358_v7, %v319_v6  ;;  %v468_v9 = vpop.f32.mrb[5].mxu1 }
 0x2e0   :  { %v361_v10 = vpop.f32.mrb[6].mxu1 }
 0x2e1   :  { %496 = vtanh.f32 %v359_v8  ;;  %v381_v11 = vmul.f32 1.442695, %v359_v8  ;;  %v469_v12 = vpop.f32.mrb[7].mxu1 }
 0x2e3   :  { %498 = vpow2.f32 %v381_v11 }
 0x2eb   :  { %v497_v15 = vpop.eup %496 }
 0x2ec   :  { %v373_v17 = vmul.f32 %v497_v15, %v371_v16 }
 0x2ed   :  { %v499_v20 = vpop.eup %498 }
 0x2ee   :  { %v380_v19 = vadd.f32 %v378_v18, %v373_v17 }
 0x2f0   :  { %v384_v21 = vsel %vm383_vm3, %v380_v19, %v499_v20 }
 0x2f1   :  { %385 = vst [vmem:[#allocation2] sm:$0xff] %v384_v21 }
 0x2f2   :  { %511 = shalt.err (!%p508_p4)
}
 0x2f3   :  { %s512_s10 = scalar_lea.hbm %s692_s9, 128 }
 0x2f4   :  { %p513_p5 = scmp.ne.s32.totalorder %s692_s9, %s512_s10  ;;  %p516_p6 = scmp.lt.u32.totalorder %s512_s10, %s692_s9 }
 0x2f6   :  { %p518_p7 = pnand %p516_p6, %p513_p5 }
 0x2f8   :  { %521 = shalt.err (!%p518_p7)
}
 0x2f9   :  { %395 = dma.vmem_to_hbm [thread:$0]  %s393_s29, 128, %s692_s9, [#allocation3]  }
 0x2fa   :  { %522 = dma.done.wait [#allocation3], 128  }
 0x2fb   :  { %523 = vsyncadd [#allocation3], 4294967168 }
 0x2fc   :  { %399 = vsyncpa [#allocation3], 1 }

</bundles_post_ra>
